<compile_context>
chip_gen: v7x
topology: tpu7x:2x2x1
jax: 0.10.0
libtpu: 0.0.40
codegen_flags: <defaults>
</compile_context>

<pallas_src>
import jax
import jax.numpy as jnp
from jax import lax
from jax.experimental import pallas as pl
from jax.experimental.pallas import tpu as pltpu


MASK_SCALE = -100000.0  # matches `attention_prob += mask * -100000.0`


def _round_up(x, m):
    return (x + m - 1) // m * m


# ---------------------------------------------------------------------------
# Kernel 1: fused QKV projection (one MXU pass over the fused [Wq|Wk|Wv] weight).
# ---------------------------------------------------------------------------
def qkv_proj_kernel(x_ref, w_ref, b_ref, q_ref, k_ref, v_ref):
    # x_ref: (1, tl, E)  embedding row tile
    # w_ref: (E, 3H)     fused [Wq | Wk | Wv]       (constant index_map -> resident)
    # b_ref: (1, 3H)     fused [bq | bk | bv], f32  (constant index_map -> resident)
    # q/k/v_ref: (1, tl, H)
    H = q_ref.shape[-1]
    x = x_ref[0]                                                      # (tl, E)
    qkv = jnp.dot(x, w_ref[...], preferred_element_type=jnp.float32) + b_ref[...]
    q_ref[0] = qkv[:, 0 * H:1 * H].astype(q_ref.dtype)
    k_ref[0] = qkv[:, 1 * H:2 * H].astype(k_ref.dtype)
    v_ref[0] = qkv[:, 2 * H:3 * H].astype(v_ref.dtype)


# ---------------------------------------------------------------------------
# Kernel 2: flash attention — online softmax over the KV grid axis.
# ---------------------------------------------------------------------------
def flash_attn_kernel(q_ref, k_ref, v_ref, mask_ref, o_ref, m_sc, l_sc, acc_sc):
    # q_ref: (1, tq, H)   k/v_ref: (1, tk, H)   mask_ref: (1, tq, tk) raw mask tile
    # o_ref: (1, tq, H)   scratch: m_sc (tq,1) f32, l_sc (tq,1) f32, acc_sc (tq,H) f32
    ki = pl.program_id(2)

    @pl.when(ki == 0)
    def _init():
        m_sc[...] = jnp.full(m_sc.shape, -jnp.inf, m_sc.dtype)
        l_sc[...] = jnp.zeros(l_sc.shape, l_sc.dtype)
        acc_sc[...] = jnp.zeros(acc_sc.shape, acc_sc.dtype)

    q = q_ref[0]                                                      # (tq, H)
    k = k_ref[0]                                                      # (tk, H)
    v = v_ref[0]                                                      # (tk, H)

    # q @ k^T: contract the last dims directly (no XLU transpose), f32 accumulation.
    s = lax.dot_general(q, k, dimension_numbers=(((1,), (1,)), ((), ())),
                        preferred_element_type=jnp.float32)           # (tq, tk)
    # Additive mask built in-kernel from the raw mask tile (keeps mask HBM traffic minimal).
    s = s + mask_ref[0].astype(jnp.float32) * MASK_SCALE

    m_prev = m_sc[...]
    m_new = jnp.maximum(m_prev, jnp.max(s, axis=-1, keepdims=True))
    alpha = jnp.exp(m_prev - m_new)
    p = jnp.exp(s - m_new)                                            # (tq, tk) f32

    l_sc[...] = alpha * l_sc[...] + jnp.sum(p, axis=-1, keepdims=True)
    acc_sc[...] = alpha * acc_sc[...] + jnp.dot(
        p.astype(v.dtype), v, preferred_element_type=jnp.float32)
    m_sc[...] = m_new

    @pl.when(ki == pl.num_programs(2) - 1)
    def _finalize():
        # Exact divide (the approx EUP reciprocal cost us the tolerance last round).
        o_ref[0] = (acc_sc[...] / l_sc[...]).astype(o_ref.dtype)


# ---------------------------------------------------------------------------
# Wrapper
# ---------------------------------------------------------------------------
def attention(embedding, mask, wq, wk, wv, bq, bk, bv, *, mxu_dtype=None, seq_tile=128):
    """Forward pass of the Attention module.

    mxu_dtype: optional narrower dtype (e.g. jnp.bfloat16) for MXU operands on v6e/v7x;
               accumulation and all mask/softmax math stay f32.
    seq_tile:  Q/KV tile length. 128 matches the MXU on v5e/v6e/v7x (256 is a v6e/v7x
               tuning option); small L falls back to a single full-length tile.
    """
    B, L, E = embedding.shape
    H = wq.shape[1]
    out_dtype = embedding.dtype
    cdt = mxu_dtype if mxu_dtype is not None else embedding.dtype

    # Sequence tiling: sublane-aligned (multiple of 8); pad L up to a tile multiple if needed.
    T = seq_tile if L >= seq_tile else _round_up(L, 8)
    Lp = _round_up(L, T)

    x = embedding
    if Lp != L:
        x = jnp.pad(x, ((0, 0), (0, Lp - L), (0, 0)))
        # Padded *key* columns get a huge mask value so their (finite) additive bias sits far
        # below any real — even masked — score; padded query rows are sliced off at the end.
        mask = jnp.pad(mask.astype(jnp.float32), ((0, 0), (0, 0), (0, Lp - L)),
                       constant_values=1.0e25)
        mask = jnp.pad(mask, ((0, 0), (0, Lp - L), (0, 0)))

    # Fused QKV weight / bias; constant index_maps keep them resident across the grid.
    w_qkv = jnp.concatenate([wq, wk, wv], axis=1).astype(cdt)           # (E, 3H)
    b_qkv = jnp.concatenate([bq, bk, bv], axis=1).astype(jnp.float32)   # (1, 3H)

    n_l = Lp // T

    # ---- kernel 1: fused QKV projection --------------------------------------------------
    q, k, v = pl.pallas_call(
        qkv_proj_kernel,
        out_shape=tuple(jax.ShapeDtypeStruct((B, Lp, H), cdt) for _ in range(3)),
        grid=(B, n_l),
        in_specs=[
            pl.BlockSpec((1, T, E), lambda b, i: (b, i, 0)),
            pl.BlockSpec((E, 3 * H), lambda b, i: (0, 0)),    # resident fused weight
            pl.BlockSpec((1, 3 * H), lambda b, i: (0, 0)),    # resident fused bias
        ],
        out_specs=tuple(pl.BlockSpec((1, T, H), lambda b, i: (b, i, 0)) for _ in range(3)),
        compiler_params=pltpu.CompilerParams(
            dimension_semantics=("parallel", "parallel")),
    )(x.astype(cdt), w_qkv, b_qkv)

    # ---- kernel 2: flash attention --------------------------------------------------------
    out = pl.pallas_call(
        flash_attn_kernel,
        out_shape=jax.ShapeDtypeStruct((B, Lp, H), out_dtype),
        grid=(B, n_l, n_l),
        in_specs=[
            pl.BlockSpec((1, T, H), lambda b, qi, ki: (b, qi, 0)),   # q: resident across KV
            pl.BlockSpec((1, T, H), lambda b, qi, ki: (b, ki, 0)),   # k
            pl.BlockSpec((1, T, H), lambda b, qi, ki: (b, ki, 0)),   # v
            pl.BlockSpec((1, T, T), lambda b, qi, ki: (b, qi, ki)),  # mask tile
        ],
        out_specs=pl.BlockSpec((1, T, H), lambda b, qi, ki: (b, qi, 0)),
        scratch_shapes=[
            pltpu.VMEM((T, 1), jnp.float32),   # running max
            pltpu.VMEM((T, 1), jnp.float32),   # running denominator
            pltpu.VMEM((T, H), jnp.float32),   # output accumulator
        ],
        compiler_params=pltpu.CompilerParams(
            dimension_semantics=("parallel", "parallel", "arbitrary")),
    )(q, k, v, mask)

    if Lp != L:
        out = out[:, :L, :]
    return out


def attention_ref(embedding, mask, wq, wk, wv, bq, bk, bv):
    q = jnp.einsum("ble,eh->blh", embedding, wq) + bq
    k = jnp.einsum("ble,eh->blh", embedding, wk) + bk
    v = jnp.einsum("ble,eh->blh", embedding, wv) + bv
    s = jnp.einsum("bqh,bkh->bqk", q, k) + mask * MASK_SCALE
    p = jax.nn.softmax(s, axis=-1)
    return jnp.einsum("bqk,bkh->bqh", p, v)


if __name__ == "__main__":
    # Full-f32 matmul passes for both the in-kernel dots and the XLA reference einsums so the
    # parity check is meaningful on real hardware as well as in interpret mode.
    jax.config.update("jax_default_matmul_precision", "highest")

    # Small shapes consistent with the module: batch=2, seq=8, embedding_dim=32, hidden_dim=32.
    B, L, E, H = 2, 8, 32, 32
    key = jax.random.PRNGKey(0)
    k_emb, k_mask, k_wq, k_wk, k_wv, k_bq, k_bk, k_bv = jax.random.split(key, 8)

    embedding = jax.random.normal(k_emb, (B, L, E), dtype=jnp.float32)
    # mask: 0 = attend, 1 = masked (added as mask * -1e5, matching the torch code)
    mask = (jax.random.uniform(k_mask, (B, L, L)) > 0.8).astype(jnp.float32)

    scale = 1.0 / jnp.sqrt(jnp.float32(E))
    wq = jax.random.normal(k_wq, (E, H), dtype=jnp.float32) * scale
    wk = jax.random.normal(k_wk, (E, H), dtype=jnp.float32) * scale
    wv = jax.random.normal(k_wv, (E, H), dtype=jnp.float32) * scale
    bq = jax.random.normal(k_bq, (1, H), dtype=jnp.float32) * 0.01
    bk = jax.random.normal(k_bk, (1, H), dtype=jnp.float32) * 0.01
    bv = jax.random.normal(k_bv, (1, H), dtype=jnp.float32) * 0.01

    out = attention(embedding, mask, wq, wk, wv, bq, bk, bv)
    out = jax.block_until_ready(out)

    ref = attention_ref(embedding, mask, wq, wk, wv, bq, bk, bv)
    assert out.shape == (B, L, H)
    max_err = jnp.max(jnp.abs(out - ref))
    assert jnp.allclose(out, ref, atol=1e-3, rtol=1e-3), f"mismatch vs reference (max abs err {max_err})"

    print("KERNEL_OK")
</pallas_src>

<mosaic_0001>
module attributes {stable_mosaic.version = 11 : i64} {
  func.func @qkv_proj_kernel(%arg0: i32, %arg1: i32, %arg2: memref<1x8x32xf32, #tpu.memory_space<vmem>>, %arg3: memref<32x96xf32, #tpu.memory_space<vmem>>, %arg4: memref<1x96xf32, #tpu.memory_space<vmem>>, %arg5: memref<1x8x32xf32, #tpu.memory_space<vmem>>, %arg6: memref<1x8x32xf32, #tpu.memory_space<vmem>>, %arg7: memref<1x8x32xf32, #tpu.memory_space<vmem>>) attributes {dimension_semantics = [#tpu.dimension_semantics<parallel>, #tpu.dimension_semantics<parallel>], iteration_bounds = array<i64: 2, 1>, scalar_prefetch = 0 : i64, scratch_operands = 0 : i64, tpu.core_type = #tpu.core_type<tc>, window_params = [{transform_indices = @transform_0, window_bounds = array<i64: 1, 8, 32>}, {pipeline_mode = #tpu.pipeline_mode<synchronous>, transform_indices = @transform_1, window_bounds = array<i64: 32, 96>}, {pipeline_mode = #tpu.pipeline_mode<synchronous>, transform_indices = @transform_2, window_bounds = array<i64: 1, 96>}, {transform_indices = @transform_3, window_bounds = array<i64: 1, 8, 32>}, {transform_indices = @transform_4, window_bounds = array<i64: 1, 8, 32>}, {transform_indices = @transform_5, window_bounds = array<i64: 1, 8, 32>}]} {
    %c0 = arith.constant 0 : index
    %c0_0 = arith.constant 0 : index
    %c0_1 = arith.constant 0 : index
    %0 = vector.load %arg2[%c0, %c0_0, %c0_1] : memref<1x8x32xf32, #tpu.memory_space<vmem>>, vector<1x8x32xf32>
    %1 = vector.shape_cast %0 : vector<1x8x32xf32> to vector<8x32xf32>
    %c0_2 = arith.constant 0 : index
    %c0_3 = arith.constant 0 : index
    %2 = vector.load %arg3[%c0_2, %c0_3] : memref<32x96xf32, #tpu.memory_space<vmem>>, vector<32x96xf32>
    %cst = arith.constant dense<0.000000e+00> : vector<8x96xf32>
    %3 = tpu.matmul %1, %2, %cst {dimension_numbers = #tpu.dot_dimension_numbers<[1], [0], [0], [1], [0, 0, 1, 1], [], []>, precision = #tpu.contract_precision<fp32>} : vector<8x32xf32>, vector<32x96xf32>, vector<8x96xf32> -> vector<8x96xf32>
    %c0_4 = arith.constant 0 : index
    %c0_5 = arith.constant 0 : index
    %4 = vector.load %arg4[%c0_4, %c0_5] : memref<1x96xf32, #tpu.memory_space<vmem>>, vector<1x96xf32>
    %5 = vector.broadcast %4 : vector<1x96xf32> to vector<8x96xf32>
    %6 = arith.addf %3, %5 : vector<8x96xf32>
    %7 = vector.extract_strided_slice %6 {offsets = [0, 0], sizes = [8, 32], strides = [1, 1]} : vector<8x96xf32> to vector<8x32xf32>
    %c0_6 = arith.constant 0 : index
    %c0_7 = arith.constant 0 : index
    %c0_8 = arith.constant 0 : index
    %8 = vector.load %arg5[%c0_6, %c0_7, %c0_8] : memref<1x8x32xf32, #tpu.memory_space<vmem>>, vector<1x8x32xf32>
    %9 = vector.shape_cast %8 : vector<1x8x32xf32> to vector<8x32xf32>
    %10 = vector.shape_cast %7 : vector<8x32xf32> to vector<1x8x32xf32>
    tpu.vector_store %arg5[%c0_6, %c0_7, %c0_8], %10 {strides = array<i32>} : memref<1x8x32xf32, #tpu.memory_space<vmem>>, vector<1x8x32xf32>,
    %11 = vector.extract_strided_slice %6 {offsets = [0, 32], sizes = [8, 32], strides = [1, 1]} : vector<8x96xf32> to vector<8x32xf32>
    %c0_9 = arith.constant 0 : index
    %c0_10 = arith.constant 0 : index
    %c0_11 = arith.constant 0 : index
    %12 = vector.load %arg6[%c0_9, %c0_10, %c0_11] : memref<1x8x32xf32, #tpu.memory_space<vmem>>, vector<1x8x32xf32>
    %13 = vector.shape_cast %12 : vector<1x8x32xf32> to vector<8x32xf32>
    %14 = vector.shape_cast %11 : vector<8x32xf32> to vector<1x8x32xf32>
    tpu.vector_store %arg6[%c0_9, %c0_10, %c0_11], %14 {strides = array<i32>} : memref<1x8x32xf32, #tpu.memory_space<vmem>>, vector<1x8x32xf32>,
    %15 = vector.extract_strided_slice %6 {offsets = [0, 64], sizes = [8, 32], strides = [1, 1]} : vector<8x96xf32> to vector<8x32xf32>
    %c0_12 = arith.constant 0 : index
    %c0_13 = arith.constant 0 : index
    %c0_14 = arith.constant 0 : index
    %16 = vector.load %arg7[%c0_12, %c0_13, %c0_14] : memref<1x8x32xf32, #tpu.memory_space<vmem>>, vector<1x8x32xf32>
    %17 = vector.shape_cast %16 : vector<1x8x32xf32> to vector<8x32xf32>
    %18 = vector.shape_cast %15 : vector<8x32xf32> to vector<1x8x32xf32>
    tpu.vector_store %arg7[%c0_12, %c0_13, %c0_14], %18 {strides = array<i32>} : memref<1x8x32xf32, #tpu.memory_space<vmem>>, vector<1x8x32xf32>,
    return
  }
  func.func @transform_0(%arg0: i32, %arg1: i32) -> (i32, i32, i32) {
    %c0_i32 = arith.constant 0 : i32
    %c0_i32_0 = arith.constant 0 : i32
    return %arg0, %arg1, %c0_i32 : i32, i32, i32
  }
  func.func @transform_1(%arg0: i32, %arg1: i32) -> (i32, i32) {
    %c0_i32 = arith.constant 0 : i32
    %c0_i32_0 = arith.constant 0 : i32
    %c0_i32_1 = arith.constant 0 : i32
    return %c0_i32, %c0_i32_0 : i32, i32
  }
  func.func @transform_2(%arg0: i32, %arg1: i32) -> (i32, i32) {
    %c0_i32 = arith.constant 0 : i32
    %c0_i32_0 = arith.constant 0 : i32
    %c0_i32_1 = arith.constant 0 : i32
    return %c0_i32, %c0_i32_0 : i32, i32
  }
  func.func @transform_3(%arg0: i32, %arg1: i32) -> (i32, i32, i32) {
    %c0_i32 = arith.constant 0 : i32
    %c0_i32_0 = arith.constant 0 : i32
    return %arg0, %arg1, %c0_i32 : i32, i32, i32
  }
  func.func @transform_4(%arg0: i32, %arg1: i32) -> (i32, i32, i32) {
    %c0_i32 = arith.constant 0 : i32
    %c0_i32_0 = arith.constant 0 : i32
    return %arg0, %arg1, %c0_i32 : i32, i32, i32
  }
  func.func @transform_5(%arg0: i32, %arg1: i32) -> (i32, i32, i32) {
    %c0_i32 = arith.constant 0 : i32
    %c0_i32_0 = arith.constant 0 : i32
    return %arg0, %arg1, %c0_i32 : i32, i32, i32
  }
}

</mosaic_0001>

<bundles_post_ra>
// kernel: tpu_custom_call.1
= control target key start
LH: loop header
LB: loop body
LE: loop exit
PB: predicated region body
PF: predicated region fallthrough
CT: control target
= control target key end

     0   :  { %11 = vsyncpa [#allocation3], 0  ;;  %s1837_s0 = inlined_call_operand.hbm [shape: f32[2,8,32], index: 0, kind: input, shape index: {}]   ;;  %s1838_s1 = inlined_call_operand.hbm [shape: f32[32,96], index: 1, kind: input, shape index: {}]   ;;  %s1839_s2 = inlined_call_operand.vmem [shape: f32[1,96], index: 2, kind: input, shape index: {}]   ;;  %s1840_s3 = inlined_call_operand.hbm [shape: f32[2,8,32], index: 3, kind: output, shape index: {0}]   ;;  %s1841_s4 = inlined_call_operand.hbm [shape: f32[2,8,32], index: 4, kind: output, shape index: {1}]   ;;  %s1842_s5 = inlined_call_operand.hbm [shape: f32[2,8,32], index: 5, kind: output, shape index: {2}]  }
   0x1   :  { %13 = vsyncpa [#allocation3 + $0x1], 0 }
   0x2   :  { %14 = vsyncpa [#allocation6], 0 }
   0x3   :  { %15 = vsyncpa [#allocation4], 0 }
   0x4   :  { %17 = vsyncpa [#allocation4 + $0x1], 0 }
   0x5   :  { %18 = vsyncpa [#allocation9], 0 }
   0x6   :  { %20 = vsyncpa [#allocation9 + $0x1], 0  ;;  %s1513_s18 = smov 0   ;;  %s1515_s19 = smov 0  }
   0x7   :  { %s1517_s20 = smov 0   ;;  %s1519_s21 = smov 0  }
   0x8   :  { %s1521_s22 = smov 0   ;;  %s1523_s23 = smov 0  }
   0x9 LB: > { %s1544_s24 = sadd.s32 4294967295, %s1469_s23   ;;  %s1846_s25 = sadd.s32 4294967294, %s1469_s23   ;;  %s1469_s23 = sphi %s1523_s23, %s26_s23   ;;  %s1465_s22 = sphi %s1521_s22, %s1866_s22   ;;  %s1461_s21 = sphi %s1519_s21, %s1865_s21   ;;  %s1457_s20 = sphi %s1517_s20, %s1864_s20   ;;  %s1453_s19 = sphi %s1515_s19, %s1863_s19   ;;  %s1449_s18 = sphi %s1513_s18, %s1862_s18  }
   0xa   : > { %p60_p0 = scmp.ne.s32.totalorder %s1453_s19, %s1449_s18  ;;  %p1843_p1 = scmp.eq.s32.totalorder %s1544_s24, 0 }
   0xb   : > { %p134_p3 = scmp.eq.s32.totalorder %s1846_s25, 1  ;;  %p1013_p5 = scmp.ge.s32.totalorder %s1469_s23, 1 }
   0xc   : > { %p1555_p4 = por %p1843_p1, %p60_p0  ;;  %p197_p7 = scmp.lt.s32.totalorder %s1469_s23, 3 }
   0xd   : > { %p1560_p6 = por %p134_p3, %p60_p0  ;;  %s1471_s29 = smov [#allocation5]  }
   0xe   : > { %s1847_s26 = scalar_select %p1555_p4, 1, 0 }
   0xf   : > { %s1848_s27 = scalar_select %p1560_p6, 1, 0 }
  0x10   : > { %p1565_p8 = pnand %p1013_p5, %p197_p7  ;;  %s209_s30 = sshll.u32 %s1471_s29, 4  ;;  %s210_s30 = int_to_ptr.vmem [resolvable:$true] %s209_s30 }
  0x11   : > { %s38_s7 = sadd.s32 1, %s1465_s22  ;;  %s1265_s10 = scalar_lea.hbm %s1838_s1, 512 }
  0x12   : > { %s1849_s28 = scalar_select %p1565_p8, 1, 0 }
  0x13   : > { %p1187_p9 = pneg %p1565_p8  ;;  %p1266_p12 = scmp.ne.s32.totalorder %s1838_s1, %s1265_s10 }
  0x14   : > { %p1272_p5 = scmp.lt.u32.totalorder %s1265_s10, %s1838_s1 }
  0x15   : > { %p1574_p11 = pnand %p1187_p9, %p1843_p1 }
  0x17   : > { %p1267_p13 = pneg %p1574_p11 }
  0x19   : > { %p1268_p0 = pnand %p1267_p13, %p1266_p12 }
  0x1b   : > { %p1269_p3 = pneg %p1268_p0 }
  0x1d   : > { %p1274_p7 = pnand %p1272_p5, %p1269_p3 }
  0x1f   : > { %1277 = shalt.err (!%p1274_p7)
}
  0x20   : > { %s1278_s15 = scalar_lea.vmem %s210_s30, 512  ;;  %p1286_p2 = scmp.lt.s32.totalorder %s210_s30, %s210_s30 }
  0x21   : > { %p1279_p9 = scmp.ne.s32.totalorder %s210_s30, %s1278_s15  ;;  %p1287_p6 = scmp.lt.s32.totalorder %s1278_s15, %s1278_s15 }
  0x23   : > { %p1281_p10 = pnand %p1279_p9, %p1267_p13  ;;  %p1288_p4 = por %p1287_p6, %p1286_p2 }
  0x25   : > { %p1282_p1 = pneg %p1281_p10 }
  0x27   : > { %p1289_p8 = pnand %p1288_p4, %p1282_p1 }
  0x29   : > { %1292 = shalt.err (!%p1289_p8)
}
  0x2a   : > { %s1472_s16 = smov 128   ;;  %s1473_s17 = smov 8  }
  0x2b   : > { %1190 = dma.hbm_to_vmem [thread:$0]  (!%p1574_p11), %s1838_s1, 512, %s210_s30, [#allocation6], %s1472_s16, %s1472_s16, %s1473_s17  }
  0x2c   : > { %p40_p1 = scmp.ge.s32.totalorder %s38_s7, 2  ;;  %s47_s9 = sadd.s32 1, %s1457_s20 }
  0x2d   : > { %p54_p2 = scmp.ne.s32.totalorder %s1457_s20, %s1453_s19  ;;  %p55_p4 = scmp.eq.s32.totalorder %s1469_s23, 0 }
  0x2e   : > { %s1868_s7 = smov (%p40_p1, %s38_s7), 0  ;;  %p1852_p8 = scmp.eq.s32.totalorder %s1544_s24, 1 }
  0x2f   : > { %p1601_p6 = por %p55_p4, %p54_p2  ;;  %s42_s6 = ssub.s32 %s1465_s22, %s1868_s7 }
  0x30   : > { %p1607_p10 = por %p1852_p8, %p54_p2  ;;  %p1206_p12 = scmp.lt.s32.totalorder %s1469_s23, 2 }
  0x31   : > { %p45_p11 = scmp.eq.s32.totalorder %s42_s6, 0  ;;  %s226_s30 = sand.u32 1, %s1457_s20  }
  0x32   : > { %s1016_s12 = sshll.u32 %s226_s30, 3  ;;  %s1017_s14 = sshll.u32 %s1465_s22, 7 }
  0x33   : > { %s1616_s13 = scalar_select %p45_p11, %s1457_s20, %s47_s9  }
  0x34   : > { %s1622_s17 = scalar_lea.hbm %s1837_s0, %s1017_s14  ;;  %s230_s29 = scalar_lea.vmem [#allocation2], %s1016_s12 }
  0x35   : > { %s238_s8 = sshll.u32 %s230_s29, 4  ;;  %p1628_p13 = pnand %p1206_p12, %p1601_p6  ;;  %s1624_s8 = int_to_ptr.vmem [resolvable:$true] %s238_s8 }
  0x36   : > { %s227_s9 = scalar_lea.sflag [#allocation3], %s226_s30  ;;  %s1293_s25 = scalar_lea.hbm %s1622_s17, 128 }
  0x37   : > { %p1294_p0 = scmp.ne.s32.totalorder %s1622_s17, %s1293_s25  ;;  %p1295_p3 = pneg %p1628_p13 }
  0x38   : > { %s1298_s15 = scalar_lea.hbm %s1837_s0, 256  ;;  %p1299_p9 = scmp.lt.u32.totalorder %s1622_s17, %s1837_s0 }
  0x39   : > { %p1296_p5 = pnand %p1295_p3, %p1294_p0  ;;  %p1300_p1 = scmp.lt.u32.totalorder %s1298_s15, %s1293_s25 }
  0x3a   : > { %p1302_p4 = scmp.lt.u32.totalorder %s1293_s25, %s1622_s17 }
  0x3b   : > { %p1297_p7 = pneg %p1296_p5  ;;  %p1301_p2 = por %p1300_p1, %p1299_p9 }
  0x3d   : > { %p1303_p6 = por %p1302_p4, %p1301_p2 }
  0x3f   : > { %p1304_p8 = pnand %p1303_p6, %p1297_p7 }
  0x41   : > { %1307 = shalt.err (!%p1304_p8)
}
  0x42   : > { %s1308_s30 = scalar_lea.vmem %s1624_s8, 128  ;;  %s1474_s29 = smov [#allocation2]  }
  0x43   : > { %p1309_p12 = scmp.ne.s32.totalorder %s1624_s8, %s1308_s30  ;;  %s1313_s12 = sshll.u32 %s1474_s29, 4  ;;  %s1314_s12 = int_to_ptr.vmem [resolvable:$false] %s1313_s12 }
  0x44   : > { %s1315_s14 = scalar_lea.vmem %s1314_s12, 256  ;;  %p1316_p5 = scmp.lt.s32.totalorder %s1624_s8, %s1314_s12 }
  0x45   : > { %p1311_p11 = pnand %p1309_p12, %p1295_p3  ;;  %p1317_p9 = scmp.lt.s32.totalorder %s1315_s14, %s1308_s30 }
  0x47   : > { %p1312_p0 = pneg %p1311_p11  ;;  %p1318_p1 = por %p1317_p9, %p1316_p5 }
  0x49   : > { %p1319_p2 = pnand %p1318_p1, %p1312_p0 }
  0x4b   : > { %1322 = shalt.err (!%p1319_p2)
}
  0x4c   : > { %1194 = dma.hbm_to_vmem [thread:$0]  (!%p1628_p13), %s1622_s17, 128, %s1624_s8, %s227_s9  }
  0x4d   : > { %p1855_p7 = scmp.ne.s32.totalorder %s1849_s28, 0 }
  0x4e   : > { %s1660_s25 = sand.u32 (!%p1855_p7), 1, %s1453_s19   ;;  %p1856_p3 = scmp.ne.s32.totalorder (!%p1855_p7), %s1847_s26, 0 }
  0x4f   : > { %247 = sbr.rel (%p1855_p7) target bundleno = 488 (0x1e8), region = 32  ;;  %s1663_s15 = sshll.u32 (!%p1855_p7), %s1660_s25, 3 }
  0x50   : > { %s250_s10 = scalar_lea.sflag (!%p1855_p7), [#allocation3], %s1660_s25  ;;  %s253_s16 = scalar_lea.vmem (!%p1855_p7), [#allocation2], %s1663_s15 }
  0x56   : > { %1432 = dma.done.wait (%p1856_p3), %s250_s10, 128  }
  0x57   : > { %1434 = vsyncadd (%p1856_p3), %s250_s10, 4294967168  ;;  %p1857_p13 = scmp.eq.s32.totalorder %s1544_s24, 0 }
  0x59   : > { %1436 = dma.done.wait (%p1857_p13), [#allocation6], 512   ;;  %p1858_p4 = pmov %p1857_p13 }
  0x5a   : > { %v1475_v0 = vmov 0.0|0.0   ;;  %vm1476_vm0 = vmmov 0   ;;  %v1477_v1 = vmov 0.0   ;;  %vm306_vm1 = vcmask 261120   ;;  %v295_v2 = vld [vmem:[#allocation5] sm:$0xff]  ;;  %v296_v3 = vld [vmem:[#allocation5 + $0x8] sm:$0xff] }
  0x5b   : > { %1438 = vsyncadd (%p1858_p4), [#allocation6], 4294966784  ;;  %1129 = vmatprep.subr.bf16.mxu1 %v1475_v0  ;;  %1147 = vmatprep.subr.bf16.mxu0 %v1475_v0  ;;  %v297_v4 = vld [vmem:[#allocation5 + $0x10] sm:$0xff]  ;;  %v311_v5 = vand.u32 4294901760, %v295_v2  ;;  %v314_v6 = vand.u32 4294901760, %v296_v3  ;;  %v298_v7 = vld [vmem:[#allocation5 + $0x18] sm:$0xff] }
  0x5c   : > { %1071 = vmatprep.mubr.msk.f32.mxu1 %vm1476_vm0, %v1477_v1  ;;  %1104 = vmatprep.mubr.msk.f32.mxu0 %vm1476_vm0, %v1477_v1  ;;  %v317_v8 = vand.u32 4294901760, %v297_v4  ;;  %v294_v9 = vld [vmem:[%s253_s16] sm:$0xff]  ;;  %v320_v10 = vand.u32 4294901760, %v298_v7  ;;  %s1704_s17 = sshll.u32 %s1461_s21, 7  ;;  %s279_s8 = scalar_lea.vmem [#allocation7], %s1663_s15 }
  0x5d   : > { %v308_v11 = vsel %vm306_vm1, %v294_v9, 0  ;;  %v1130_v12 = vpack.c.bf16 %v314_v6, %v311_v5  ;;  %v391_v13 = vsub.f32 %v295_v2, %v311_v5  ;;  %v398_v14 = vsub.f32 %v296_v3, %v314_v6  ;;  %v1024_v41 = vld [vmem:[%s1839_s2] ss:$0 sm:$0xff]  ;;  %s830_s6 = sshll.u32 %s279_s8, 4  ;;  %s1711_s29 = scalar_lea.hbm %s1840_s3, %s1704_s17  ;;  %s1713_s6 = int_to_ptr.vmem [resolvable:$true] %s830_s6 }
  0x5e   : > { %v405_v15 = vsub.f32 %v297_v4, %v317_v8  ;;  %v412_v16 = vsub.f32 %v298_v7, %v320_v10  ;;  %v379_v17 = vand.u32 4294901760, %v308_v11  ;;  %v1133_v18 = vpack.c.bf16 %v320_v10, %v317_v8  ;;  %s1478_s12 = smov 96   ;;  %s806_s21 = scalar_lea.sflag [#allocation4], %s1660_s25 }
  0x5f   : > { %1131 = vmatpush3.bf16.msra.mxu1 %v1130_v12  ;;  %1149 = vmatpush3.bf16.msra.mxu0 %v1130_v12  ;;  %v392_v19 = vand.u32 4294901760, %v391_v13  ;;  %v399_v20 = vand.u32 4294901760, %v398_v14  ;;  %v1142_v39 = vpack.c.bf16 %v398_v14, %v391_v13  ;;  %s1323_s14 = scalar_lea.vmem %s1713_s6, 128  ;;  %s1479_s10 = smov [#allocation7]  }
  0x60   : > { %v406_v21 = vand.u32 4294901760, %v405_v15  ;;  %1132 = vmatprep.subr.bf16.mxu1 %v1475_v0  ;;  %1150 = vmatprep.subr.bf16.mxu0 %v1475_v0  ;;  %v380_v22 = vsub.f32 %v308_v11, %v379_v17  ;;  %v413_v23 = vand.u32 4294901760, %v412_v16  ;;  %v1145_v40 = vpack.c.bf16 %v412_v16, %v405_v15  ;;  %p1324_p6 = scmp.ne.s32.totalorder %s1713_s6, %s1323_s14  ;;  %s1327_s16 = sshll.u32 %s1479_s10, 4  ;;  %s1328_s16 = int_to_ptr.vmem [resolvable:$false] %s1327_s16 }
  0x61   : > { %v393_v24 = vsub.f32 %v391_v13, %v392_v19  ;;  %v400_v25 = vsub.f32 %v398_v14, %v399_v20  ;;  %v1154_v31 = vpack.c.bf16 %v399_v20, %v392_v19  ;;  %s1329_s26 = scalar_lea.vmem %s1328_s16, 256  ;;  %p1330_p11 = scmp.lt.s32.totalorder %s1713_s6, %s1328_s16 }
  0x62   : > { %v407_v26 = vsub.f32 %v405_v15, %v406_v21  ;;  %v381_v27 = vand.u32 4294901760, %v380_v22  ;;  %v414_v28 = vsub.f32 %v412_v16, %v413_v23  ;;  %v1157_v37 = vpack.c.bf16 %v413_v23, %v406_v21  ;;  %p1325_p8 = pnand %p1324_p6, %p1607_p10  ;;  %p1331_p0 = scmp.lt.s32.totalorder %s1329_s26, %s1323_s14 }
  0x63   : > { %1134 = vmatpush3.bf16.msra.mxu1 %v1133_v18  ;;  %1152 = vmatpush3.bf16.msra.mxu0 %v1133_v18  ;;  %v394_v29 = vand.u32 4294901760, %v393_v24  ;;  %v401_v30 = vand.u32 4294901760, %v400_v25 }
  0x64   : > { %v382_v32 = vsub.f32 %v380_v22, %v381_v27  ;;  %1135 = vmatprep.subr.bf16.mxu1 %v1475_v0  ;;  %1153 = vmatprep.subr.bf16.mxu0 %v1475_v0  ;;  %v408_v34 = vand.u32 4294901760, %v407_v26  ;;  %v415_v35 = vand.u32 4294901760, %v414_v28  ;;  %p1326_p12 = pneg %p1325_p8  ;;  %p1332_p5 = por %p1331_p0, %p1330_p11 }
  0x65   : > { %v1136_v33 = vpack.c.bf16 %v401_v30, %v394_v29 }
  0x66   : > { %v383_v36 = vand.u32 4294901760, %v382_v32  ;;  %1105 = vmatmul.mubr.f32.vlgmr.msra.gmra.mrb[0].mxu0 %v381_v27  ;;  %v1139_v38 = vpack.c.bf16 %v415_v35, %v408_v34  ;;  %p1333_p9 = pnand %p1332_p5, %p1326_p12 }
  0x67   : > { %1155 = vmatpush3.bf16.msra.mxu0 %v1154_v31  ;;  %1115 = vmatprep.mubr.msk.f32.mxu0 %vm1476_vm0, %v1477_v1 }
  0x68   : > { %1072 = vmatmul.mubr.f32.vlgmr.msra.gmra.mrb[0].mxu1 %v383_v36  ;;  %1156 = vmatprep.subr.bf16.mxu0 %v1475_v0 }
  0x69   : > { %1137 = vmatpush3.bf16.msra.mxu1 %v1136_v33  ;;  %1082 = vmatprep.mubr.msk.f32.mxu1 %vm1476_vm0, %v1477_v1 }
  0x6a   : > { %1138 = vmatprep.subr.bf16.mxu1 %v1475_v0 }
  0x6b   : > { %1158 = vmatpush3.bf16.msra.mxu0 %v1157_v37 }
  0x6c   : > { %1159 = vmatprep.subr.bf16.mxu0 %v1475_v0 }
  0x6d   : > { %1140 = vmatpush3.bf16.msra.mxu1 %v1139_v38 }
  0x6e   : > { %1141 = vmatprep.subr.bf16.mxu1 %v1475_v0  ;;  %1116 = vmatmul.mubr.f32.vlgmr.msra.gmra.mrb[0].mxu0 %v379_v17 }
  0x6f   : > { %1161 = vmatpush3.bf16.msra.mxu0 %v1130_v12  ;;  %1126 = vmatprep.mubr.msk.f32.mxu0 %vm1476_vm0, %v1477_v1 }
  0x70   : > { %1083 = vmatmul.mubr.f32.vlgmr.msra.gmra.mrb[0].mxu1 %v379_v17  ;;  %1162 = vmatprep.subr.bf16.mxu0 %v1475_v0 }
  0x71   : > { %1143 = vmatpush3.bf16.msra.mxu1 %v1142_v39  ;;  %1093 = vmatprep.mubr.msk.f32.mxu1 %vm1476_vm0, %v1477_v1 }
  0x72   : > { %1144 = vmatprep.subr.bf16.mxu1 %v1475_v0 }
  0x73   : > { %1164 = vmatpush3.bf16.msra.mxu0 %v1133_v18 }
  0x75   : > { %1146 = vmatpush3.bf16.msra.mxu1 %v1145_v40 }
  0x76   : > { %1127 = vmatmul.mubr.f32.vlgmr.msra.gmra.mrb[0].mxu0 %v379_v17 }
  0x78   : > { %1094 = vmatmul.mubr.f32.vlgmr.msra.gmra.mrb[0].mxu1 %v380_v22 }
 0x149   : > { %v791_v42 = vpop.f32.mrb[0].mxu0 }
 0x14a   : > { %v1128_v43 = vpop.f32.mrb[1].mxu0 }
 0x14b   : > { %v556_v44 = vpop.f32.mrb[0].mxu1 }
 0x14c   : > { %v1165_v45 = vadd.f32 %v1024_v41, %v556_v44  ;;  %v1095_v46 = vpop.f32.mrb[1].mxu1 }
 0x14e   : > { %v1166_v47 = vadd.f32 %v1165_v45, %v791_v42 }
 0x150   : > { %797 = vrot.lane.b32.xlu0 %v1166_v47, %s1478_s12  ;;  %795 = vst.msk [vmem:[%s279_s8] sm:$0xff] %vm306_vm1, %v1166_v47 }
 0x151   : > { %1336 = shalt.err (!%p1333_p9)
}
 0x152   : > { %s1337_s25 = scalar_lea.hbm %s1711_s29, 128  ;;  %s1341_s9 = scalar_lea.hbm %s1840_s3, 256 }
 0x153   : > { %p1338_p1 = scmp.ne.s32.totalorder %s1711_s29, %s1337_s25  ;;  %p1342_p3 = scmp.lt.u32.totalorder %s1711_s29, %s1840_s3 }
 0x154   : > { %p1343_p13 = scmp.lt.u32.totalorder %s1341_s9, %s1337_s25  ;;  %p1345_p6 = scmp.lt.u32.totalorder %s1337_s25, %s1711_s29 }
 0x155   : > { %p1339_p2 = pnand %p1338_p1, %p1607_p10 }
 0x156   : > { %p1344_p4 = por %p1343_p13, %p1342_p3 }
 0x157   : > { %p1340_p7 = pneg %p1339_p2 }
 0x158   : > { %p1346_p8 = por %p1345_p6, %p1344_p4 }
 0x15a   : > { %p1347_p12 = pnand %p1346_p8, %p1340_p7 }
 0x15c   : > { %1350 = shalt.err (!%p1347_p12)
}
 0x15d   : > { %1181 = dma.vmem_to_hbm [thread:$0]  (%p1607_p10), %s1713_s6, 128, %s1711_s29, %s806_s21  }
 0x15e   : > { %s1480_s14 = smov 64   ;;  %s810_s10 = sand.u32 1, %s1544_s24  }
 0x15f   : > { %801 = vrot.lane.b32.xlu0 %v1166_v47, %s1480_s14  ;;  %s286_s16 = scalar_lea.vmem [#allocation8], %s1663_s15  ;;  %s1744_s8 = scalar_lea.hbm %s1841_s4, %s1704_s17 }
 0x160   : > { %s844_s26 = sshll.u32 %s286_s16, 4  ;;  %s293_s9 = scalar_lea.vmem [#allocation10], %s1663_s15  ;;  %s1746_s26 = int_to_ptr.vmem [resolvable:$true] %s844_s26 }
 0x161   : > { %s1751_s30 = sshll.u32 %s293_s9, 4  ;;  %s1754_s24 = scalar_lea.sflag [#allocation9], %s810_s10  ;;  %s1785_s30 = int_to_ptr.vmem [resolvable:$true] %s1751_s30 }
 0x162   : > { %s1351_s6 = scalar_lea.vmem %s1746_s26, 128  ;;  %s1481_s29 = smov [#allocation8]  }
 0x163   : > { %p1352_p11 = scmp.ne.s32.totalorder %s1746_s26, %s1351_s6  ;;  %s1355_s21 = sshll.u32 %s1481_s29, 4  ;;  %s1356_s21 = int_to_ptr.vmem [resolvable:$false] %s1355_s21 }
 0x164   : > { %s1357_s12 = scalar_lea.vmem %s1356_s21, 256  ;;  %p1358_p9 = scmp.lt.s32.totalorder %s1746_s26, %s1356_s21 }
 0x165   : > { %p1353_p0 = pnand %p1352_p11, %p1607_p10  ;;  %p1359_p1 = scmp.lt.s32.totalorder %s1357_s12, %s1351_s6 }
 0x167   : > { %p1354_p5 = pneg %p1353_p0  ;;  %p1360_p2 = por %p1359_p1, %p1358_p9 }
 0x169   : > { %p1361_p7 = pnand %p1360_p2, %p1354_p5 }
 0x1c2   : > { %v798_v48 = vpop.permute.xlu0 %797 }
 0x1c3   : > { %800 = vst.msk [vmem:[%s286_s16] sm:$0xff] %vm306_vm1, %v798_v48 }
 0x1c4   : > { %1364 = shalt.err (!%p1361_p7)
}
 0x1c5   : > { %s1365_s14 = scalar_lea.hbm %s1744_s8, 128  ;;  %s1369_s25 = scalar_lea.hbm %s1841_s4, 256 }
 0x1c6   : > { %p1366_p3 = scmp.ne.s32.totalorder %s1744_s8, %s1365_s14  ;;  %p1370_p6 = scmp.lt.u32.totalorder %s1744_s8, %s1841_s4 }
 0x1c7   : > { %p1371_p8 = scmp.lt.u32.totalorder %s1369_s25, %s1365_s14  ;;  %p1373_p11 = scmp.lt.u32.totalorder %s1365_s14, %s1744_s8 }
 0x1c8   : > { %p1367_p13 = pnand %p1366_p3, %p1607_p10 }
 0x1c9   : > { %p1372_p12 = por %p1371_p8, %p1370_p6 }
 0x1ca   : > { %p1368_p4 = pneg %p1367_p13 }
 0x1cb   : > { %p1374_p0 = por %p1373_p11, %p1372_p12 }
 0x1cd   : > { %p1375_p5 = pnand %p1374_p0, %p1368_p4 }
 0x1cf   : > { %1378 = shalt.err (!%p1375_p5)
}
 0x1d0   : > { %1182 = dma.vmem_to_hbm [thread:$0]  (%p1607_p10), %s1746_s26, 128, %s1744_s8, %s1754_s24  }
 0x1d1   : > { %s1782_s12 = scalar_lea.hbm %s1842_s5, %s1704_s17  ;;  %v802_v49 = vpop.permute.xlu0 %801  ;;  %s1379_s14 = scalar_lea.vmem %s1785_s30, 128 }
 0x1d2   : > { %804 = vst.msk [vmem:[%s293_s9] sm:$0xff] %vm306_vm1, %v802_v49  ;;  %p1380_p9 = scmp.ne.s32.totalorder %s1785_s30, %s1379_s14  ;;  %s1482_s26 = smov [#allocation10]  }
 0x1d3   : > { %s1383_s8 = sshll.u32 %s1482_s26, 4  ;;  %s1384_s8 = int_to_ptr.vmem [resolvable:$false] %s1383_s8 }
 0x1d4   : > { %p1381_p1 = pnand %p1380_p9, %p1607_p10  ;;  %s1385_s10 = scalar_lea.vmem %s1384_s8, 256 }
 0x1d5   : > { %p1386_p7 = scmp.lt.s32.totalorder %s1785_s30, %s1384_s8  ;;  %p1387_p3 = scmp.lt.s32.totalorder %s1385_s10, %s1379_s14 }
 0x1d6   : > { %p1382_p2 = pneg %p1381_p1 }
 0x1d7   : > { %p1388_p13 = por %p1387_p3, %p1386_p7 }
 0x1d9   : > { %p1389_p4 = pnand %p1388_p13, %p1382_p2 }
 0x1db   : > { %1392 = shalt.err (!%p1389_p4)
}
 0x1dc   : > { %s1393_s15 = scalar_lea.hbm %s1782_s12, 128  ;;  %s1397_s16 = scalar_lea.hbm %s1842_s5, 256 }
 0x1dd   : > { %p1394_p6 = scmp.ne.s32.totalorder %s1782_s12, %s1393_s15  ;;  %p1398_p11 = scmp.lt.u32.totalorder %s1782_s12, %s1842_s5 }
 0x1de   : > { %p1399_p0 = scmp.lt.u32.totalorder %s1397_s16, %s1393_s15  ;;  %p1401_p9 = scmp.lt.u32.totalorder %s1393_s15, %s1782_s12 }
 0x1df   : > { %p1395_p8 = pnand %p1394_p6, %p1607_p10 }
 0x1e0   : > { %p1400_p5 = por %p1399_p0, %p1398_p11 }
 0x1e1   : > { %p1396_p12 = pneg %p1395_p8 }
 0x1e2   : > { %p1402_p1 = por %p1401_p9, %p1400_p5 }
 0x1e4   : > { %p1403_p2 = pnand %p1402_p1, %p1396_p12 }
 0x1e6   : > { %1406 = shalt.err (!%p1403_p2)
}
 0x1e7   : > { %1183 = dma.vmem_to_hbm [thread:$0]  (%p1607_p10), %s1785_s30, 128, %s1782_s12, %s1754_s24  }
 0x1e8 PF: > { %s870_s29 = sand.u32 1, %s1449_s18   ;;  %p1859_p7 = scmp.ne.s32.totalorder %s1848_s27, 0 }
 0x1e9   : > { %p1860_p3 = scmp.ge.s32.totalorder %s1469_s23, 2  ;;  %s871_s6 = scalar_lea.sflag [#allocation4], %s870_s29 }
 0x1eb   : > { %p1196_p13 = pnand %p1860_p3, %p1859_p7 }
 0x1ed   : > { %1440 = dma.done.wait (!%p1196_p13), %s871_s6, 128  }
 0x1ee   : > { %1442 = vsyncadd (!%p1196_p13), %s871_s6, 4294967168  ;;  %s1861_s21 = sadd.s32 4294967294, %s1469_s23  }
 0x1ef   : > { %s879_s14 = sand.u32 1, %s1861_s21  }
 0x1f0   : > { %s880_s26 = scalar_lea.sflag [#allocation9], %s879_s14 }
 0x1f1   : > { %1444 = dma.done.wait (!%p1196_p13), %s880_s26, 256  }
 0x1f2   : > { %1446 = vsyncadd (!%p1196_p13), %s880_s26, 4294967040  ;;  %s26_s23 = sadd.s32 1, %s1469_s23   ;;  %s1862_s18 = smov %s1453_s19 }
 0x1f3   : > { %p23_p10 = scmp.ge.s32.totalorder %s26_s23, 4   ;;  %s1863_s19 = smov %s1457_s20 }
 0x1f4   : > { %s1864_s20 = smov %s1616_s13  ;;  %s1865_s21 = smov %s1465_s22 }
 0x1f5   : > { %s1866_s22 = smov %s1868_s7  ;;  %25 = sbr.rel (!%p23_p10) target bundleno = 9 (0x9), region = 113 }
 0x1fc   :  { %894 = vsyncpa [#allocation3], 1 }
 0x1fd   :  { %896 = vsyncpa [#allocation3 + $0x1], 1 }
 0x1fe   :  { %897 = vsyncpa [#allocation6], 1 }
 0x1ff   :  { %898 = vsyncpa [#allocation4], 1 }
 0x200   :  { %900 = vsyncpa [#allocation4 + $0x1], 1 }
 0x201   :  { %901 = vsyncpa [#allocation9], 1 }
 0x202   :  { %903 = vsyncpa [#allocation9 + $0x1], 1 }

</bundles_post_ra>
